<compile_context>
chip_gen: v7x
topology: tpu7x:2x2x1
jax: 0.10.0
libtpu: 0.0.40
codegen_flags: <defaults>
</compile_context>

<pallas_src>
import jax
import jax.numpy as jnp
from jax.experimental import pallas as pl
from jax.experimental.pallas import tpu as pltpu

_LANES = 128                       # vreg lane width (last dim)
_MAX_BLOCK_BYTES = 4 * 1024 * 1024  # 4 MiB per tile
_VMEM_LIMIT_BYTES = 40 << 20        # safe on v5e/v6e (128 MiB phys) and v7x (64 MiB)


def _copy_kernel(x_ref, o_ref):
    # Whole lane-dense tile resident in VMEM; straight copy (DMA/HBM-bound).
    o_ref[...] = x_ref[...]


def _sublanes_for(dtype) -> int:
    """Rows packed per vreg for this dtype (f32:8, bf16:16, int8:32)."""
    itemsize = jnp.dtype(dtype).itemsize
    return {4: 8, 2: 16, 1: 32}.get(itemsize, 8)


def _forward_impl(x: jax.Array) -> jax.Array:
    orig_shape = x.shape
    n = x.size
    dtype = x.dtype
    itemsize = jnp.dtype(dtype).itemsize
    sublanes = _sublanes_for(dtype)

    # ---- lane-dense 2D view: (rows, 128). Pad ONLY when n is not 128-aligned.
    rows = pl.cdiv(n, _LANES)
    padded = rows * _LANES

    flat = x.reshape(-1)
    if padded != n:
        # Misaligned tail: one unavoidable full-copy pad.
        flat = jnp.pad(flat, (0, padded - n))
    x2d = flat.reshape(rows, _LANES)

    # ---- block_rows: sublane-packed multiple, capped at _MAX_BLOCK_BYTES.
    max_block_rows = max(
        sublanes,
        (_MAX_BLOCK_BYTES // (_LANES * itemsize)) // sublanes * sublanes,
    )
    if rows <= max_block_rows:
        # Full-extent block: legal regardless of sublane alignment of `rows`.
        block_rows = rows
    else:
        block_rows = max_block_rows

    grid = (pl.cdiv(rows, block_rows),)  # partial last block masked by Pallas

    out2d = pl.pallas_call(
        _copy_kernel,
        out_shape=jax.ShapeDtypeStruct((rows, _LANES), dtype),
        grid=grid,
        in_specs=[pl.BlockSpec((block_rows, _LANES), lambda i: (i, 0))],
        out_specs=pl.BlockSpec((block_rows, _LANES), lambda i: (i, 0)),
        compiler_params=pltpu.CompilerParams(
            dimension_semantics=("parallel",),
            vmem_limit_bytes=_VMEM_LIMIT_BYTES,
        ),
    )(x2d)

    if padded != n:
        return out2d.reshape(-1)[:n].reshape(orig_shape)
    return out2d.reshape(orig_shape)  # metadata-only in the aligned case


@jax.jit
def segmenter_forward(x: jax.Array) -> jax.Array:
    """Forward pass of Segmenter: identity plumbing through a Pallas kernel."""
    if x.size == 0:            # static shape check; avoids zero-size grid
        return x
    return _forward_impl(x)


if __name__ == "__main__":
    key = jax.random.PRNGKey(0)
    # Small, forward-consistent shape: batch=2, channels=4, spatial=16x16.
    x = jax.random.normal(key, (2, 4, 16, 16), dtype=jnp.float32)

    y = segmenter_forward(x)
    jax.block_until_ready(y)

    # Correctness check against the (identity-plumbing) reference semantics.
    assert y.shape == x.shape and y.dtype == x.dtype
    assert bool(jnp.allclose(y, x)), "identity forward mismatch"

    print("KERNEL_OK")
</pallas_src>

<mosaic_0001>
module attributes {stable_mosaic.version = 11 : i64} {
  func.func @_copy_kernel(%arg0: i32, %arg1: memref<16x128xf32, #tpu.memory_space<vmem>>, %arg2: memref<16x128xf32, #tpu.memory_space<vmem>>) attributes {dimension_semantics = [#tpu.dimension_semantics<parallel>], iteration_bounds = array<i64: 1>, scalar_prefetch = 0 : i64, scratch_operands = 0 : i64, tpu.core_type = #tpu.core_type<tc>, window_params = [{transform_indices = @transform_0, window_bounds = array<i64: 16, 128>}, {transform_indices = @transform_1, window_bounds = array<i64: 16, 128>}]} {
    %c0 = arith.constant 0 : index
    %c0_0 = arith.constant 0 : index
    %0 = vector.load %arg1[%c0, %c0_0] : memref<16x128xf32, #tpu.memory_space<vmem>>, vector<16x128xf32>
    %c0_1 = arith.constant 0 : index
    %c0_2 = arith.constant 0 : index
    %1 = vector.load %arg2[%c0_1, %c0_2] : memref<16x128xf32, #tpu.memory_space<vmem>>, vector<16x128xf32>
    tpu.vector_store %arg2[%c0_1, %c0_2], %0 {strides = array<i32>} : memref<16x128xf32, #tpu.memory_space<vmem>>, vector<16x128xf32>,
    return
  }
  func.func @transform_0(%arg0: i32) -> (i32, i32) {
    %c0_i32 = arith.constant 0 : i32
    %c0_i32_0 = arith.constant 0 : i32
    return %arg0, %c0_i32 : i32, i32
  }
  func.func @transform_1(%arg0: i32) -> (i32, i32) {
    %c0_i32 = arith.constant 0 : i32
    %c0_i32_0 = arith.constant 0 : i32
    return %arg0, %c0_i32 : i32, i32
  }
}

</mosaic_0001>

<bundles_post_ra>
// kernel: segmenter_forward.1
= control target key start
LH: loop header
LB: loop body
LE: loop exit
PB: predicated region body
PF: predicated region fallthrough
CT: control target
= control target key end

     0   :  { %s38_s0 = inlined_call_operand.vmem [shape: f32[16,128], index: 0, kind: input, shape index: {}]   ;;  %s39_s1 = inlined_call_operand.vmem [shape: f32[16,128], index: 1, kind: output, shape index: {}]  }
   0x1   :  { %v8_v0 = vld [vmem:[%s38_s0] sm:$0xff]  ;;  %v9_v1 = vld [vmem:[%s38_s0 + $0x8] sm:$0xff] }
   0x2   :  { %10 = vst [vmem:[%s39_s1] sm:$0xff] %v8_v0  ;;  %11 = vst [vmem:[%s39_s1 + $0x8] sm:$0xff] %v9_v1 }

</bundles_post_ra>
